<compile_context>
chip_gen: v7x
topology: tpu7x:2x2x1
jax: 0.10.0
libtpu: 0.0.40
codegen_flags: <defaults>
</compile_context>

<pallas_src>
import functools

import jax
import jax.numpy as jnp
from jax.experimental import pallas as pl
from jax.experimental.pallas import tpu as pltpu


def _layernorm(x, w, b, eps=1e-5):
    # x: (T, E) f32; w, b: (1, E).  PyTorch LayerNorm uses population variance.
    mean = jnp.mean(x, axis=-1, keepdims=True)
    var = jnp.mean((x - mean) ** 2, axis=-1, keepdims=True)
    return (x - mean) * jax.lax.rsqrt(var + eps) * w + b


def gpt_block_kernel(
    x_ref,                          # (S, E)  f32   full sequence, current batch
    wq_ref, bq_ref,                 # (E, E) bf16, (1, E) f32
    wkv_ref, bkv_ref,               # (E, 2E) bf16, (1, 2E) f32   (K | V packed)
    wo_ref, bo_ref,                 # (E, E) bf16, (1, E) f32
    ln1w_ref, ln1b_ref,             # (1, E) f32
    w1_ref, b1_ref,                 # (E, 4E) bf16, (1, 4E) f32
    w2_ref, b2_ref,                 # (4E, E) bf16, (1, E) f32
    ln2w_ref, ln2b_ref,             # (1, E) f32
    out_ref,                        # (TQ, E) f32   current query tile
    k_scratch, v_scratch,           # (S, E) bf16   persist across query tiles
    o_scratch,                      # (TQ, E) bf16  concatenated head outputs
    *, num_heads,
):
    S, E = x_ref.shape
    q_tile = out_ref.shape[0]
    hd = E // num_heads
    scale = 1.0 / (hd ** 0.5)
    qi = pl.program_id(1)

    # ---- K/V projection: once per batch element, reused by every query tile ----
    @pl.when(qi == 0)
    def _():
        x_bf = x_ref[...].astype(jnp.bfloat16)                        # (S, E)
        kv = jnp.dot(x_bf, wkv_ref[...],
                     preferred_element_type=jnp.float32) + bkv_ref[...]
        k_scratch[...] = kv[:, :E].astype(jnp.bfloat16)
        v_scratch[...] = kv[:, E:].astype(jnp.bfloat16)

    # ---- Q projection for this tile: one lane-dense (TQ,E)@(E,E) matmul ----
    q_start = pl.multiple_of(qi * q_tile, q_tile)
    x_q = x_ref[pl.ds(q_start, q_tile), :]                            # (TQ, E) f32
    q = jnp.dot(x_q.astype(jnp.bfloat16), wq_ref[...],
                preferred_element_type=jnp.float32) + bq_ref[...]
    q = (q * scale).astype(jnp.bfloat16)                              # (TQ, E)

    k = k_scratch[...]                                                # (S, E) bf16
    v = v_scratch[...]

    # ---- Attention, one head at a time (live score block bounded to (TQ, S)) ----
    # TODO(synk): for very long S, additionally tile the key axis with an online
    # softmax so the live score block shrinks to (TQ, TK).
    for h in range(num_heads):
        hs = h * hd
        q_h = q[:, hs:hs + hd]                                        # (TQ, hd)
        k_h = k[:, hs:hs + hd]                                        # (S, hd)
        v_h = v[:, hs:hs + hd]                                        # (S, hd)
        s = jax.lax.dot_general(q_h, k_h, (((1,), (1,)), ((), ())),
                                preferred_element_type=jnp.float32)   # (TQ, S)
        s = s - jnp.max(s, axis=-1, keepdims=True)
        p = jnp.exp(s)
        p = p * pl.reciprocal(jnp.sum(p, axis=-1, keepdims=True), approx=True)
        o_h = jnp.dot(p.astype(jnp.bfloat16), v_h,
                      preferred_element_type=jnp.float32)             # (TQ, hd)
        o_scratch[:, hs:hs + hd] = o_h.astype(jnp.bfloat16)

    # ---- Output projection: head concat folded into ONE full-K matmul ----
    attn = jnp.dot(o_scratch[...], wo_ref[...],
                   preferred_element_type=jnp.float32) + bo_ref[...]

    # ---- Residual + LayerNorm 1 (f32) ----
    x1 = _layernorm(x_q + attn, ln1w_ref[...], ln1b_ref[...])

    # ---- MLP: Linear(E,4E) -> ReLU -> Linear(4E,E)  (Dropout = identity) ----
    # TODO(synk): on v7x with large E, stream W1/W2 in column/row tiles (inner
    # pipeline) instead of keeping both resident in VMEM.
    h1 = jnp.dot(x1.astype(jnp.bfloat16), w1_ref[...],
                 preferred_element_type=jnp.float32) + b1_ref[...]
    h1 = jnp.maximum(h1, 0.0)
    h2 = jnp.dot(h1.astype(jnp.bfloat16), w2_ref[...],
                 preferred_element_type=jnp.float32) + b2_ref[...]

    # ---- Residual + LayerNorm 2 ----
    out_ref[...] = _layernorm(x1 + h2, ln2w_ref[...], ln2b_ref[...])


def _prep_weights(params):
    """Host-side re-layout + bf16 pre-cast of PyTorch-style weights (done once)."""
    bf16, f32 = jnp.bfloat16, jnp.float32
    wq = jnp.transpose(params["wq"]).astype(bf16)                     # (E, E)
    wkv = jnp.concatenate(
        [jnp.transpose(params["wk"]), jnp.transpose(params["wv"])], axis=1
    ).astype(bf16)                                                    # (E, 2E)
    bkv = jnp.concatenate([params["bk"], params["bv"]], axis=1).astype(f32)
    return (
        wq, params["bq"].astype(f32),
        wkv, bkv,
        jnp.transpose(params["wo"]).astype(bf16), params["bo"].astype(f32),
        params["ln1w"].astype(f32), params["ln1b"].astype(f32),
        jnp.transpose(params["w1"]).astype(bf16), params["b1"].astype(f32),
        jnp.transpose(params["w2"]).astype(bf16), params["b2"].astype(f32),
        params["ln2w"].astype(f32), params["ln2b"].astype(f32),
    )


def _pick_q_tile(S):
    for t in (512, 256, 128):
        if S % t == 0:
            return t
    return S


def _pick_vmem_limit():
    # Stay well inside physical VMEM (64 MiB/core on v7x, 128 MiB on v5e/v6e).
    try:
        cap = int(pltpu.get_tpu_info().vmem_capacity_bytes)
    except Exception:
        return None
    return int(max(32 * 1024 * 1024,
                   min(cap - 16 * 1024 * 1024, 100 * 1024 * 1024)))


def gpt_block_forward(x_sbe, params, num_heads, q_tile=None):
    """x_sbe: (seq, batch, embed) f32, matching PyTorch MultiheadAttention layout."""
    S, B, E = x_sbe.shape
    assert E % num_heads == 0
    if q_tile is None:
        q_tile = _pick_q_tile(S)
    assert S % q_tile == 0, "seq length must be divisible by the query tile"
    nq = S // q_tile

    # TODO(synk): fold the (S,B,E)<->(B,S,E) layout change into the BlockSpec
    # index_maps (strided batch picks) to drop these two extra HBM passes.
    x = jnp.transpose(x_sbe, (1, 0, 2))                               # (B, S, E)

    weights = _prep_weights(params)

    # Weight block indices never change, so they are DMA'd once and stay resident.
    # TODO(synk): pipeline_mode=pl.Buffered(1) (or a one-shot pl.ANY DMA) would
    # drop the unused second pipeline buffer for these on VMEM-tight v7x.
    def wspec(arr):
        return pl.BlockSpec(arr.shape, lambda b, qi: (0, 0))

    in_specs = [pl.BlockSpec((None, S, E), lambda b, qi: (b, 0, 0))]
    in_specs += [wspec(w) for w in weights]
    out_specs = pl.BlockSpec((None, q_tile, E), lambda b, qi: (b, qi, 0))

    flops = B * (4 * S * E * E            # K/V projection (once per batch)
                 + 20 * S * E * E         # Q + out-projection + MLP over all tiles
                 + 4 * S * S * E)         # QK^T and PV
    weight_bytes = sum(int(w.size) * w.dtype.itemsize for w in weights)
    cost = pl.CostEstimate(
        flops=int(flops),
        transcendentals=int(B * num_heads * S * S),
        bytes_accessed=int(2 * B * S * E * 4 + weight_bytes),
    )

    out = pl.pallas_call(
        functools.partial(gpt_block_kernel, num_heads=num_heads),
        out_shape=jax.ShapeDtypeStruct((B, S, E), jnp.float32),
        grid_spec=pltpu.PrefetchScalarGridSpec(
            num_scalar_prefetch=0,
            grid=(B, nq),
            in_specs=in_specs,
            out_specs=out_specs,
            scratch_shapes=[
                pltpu.VMEM((S, E), jnp.bfloat16),        # K (all heads)
                pltpu.VMEM((S, E), jnp.bfloat16),        # V (all heads)
                pltpu.VMEM((q_tile, E), jnp.bfloat16),   # concat head outputs
            ],
        ),
        compiler_params=pltpu.CompilerParams(
            # qi is 'arbitrary': the K/V scratch is carried across query tiles.
            dimension_semantics=("parallel", "arbitrary"),
            vmem_limit_bytes=_pick_vmem_limit(),
        ),
        cost_estimate=cost,
    )(x, *weights)

    return jnp.transpose(out, (1, 0, 2))                              # (S, B, E)


def _reference_forward(x_sbe, params, num_heads):
    """Pure-JAX f32 reference matching PyTorch GPTBlock.forward (eval mode)."""
    S, B, E = x_sbe.shape
    hd = E // num_heads
    x = jnp.transpose(x_sbe, (1, 0, 2))                               # (B, S, E)

    q = x @ params["wq"].T + params["bq"]
    k = x @ params["wk"].T + params["bk"]
    v = x @ params["wv"].T + params["bv"]
    q = q.reshape(B, S, num_heads, hd).transpose(0, 2, 1, 3)
    k = k.reshape(B, S, num_heads, hd).transpose(0, 2, 1, 3)
    v = v.reshape(B, S, num_heads, hd).transpose(0, 2, 1, 3)
    s = jnp.einsum("bhqd,bhkd->bhqk", q, k) / (hd ** 0.5)
    p = jax.nn.softmax(s, axis=-1)
    attn = jnp.einsum("bhqk,bhkd->bhqd", p, v).transpose(0, 2, 1, 3).reshape(B, S, E)
    attn = attn @ params["wo"].T + params["bo"]

    def ln(z, w, b):
        m = jnp.mean(z, axis=-1, keepdims=True)
        var = jnp.mean((z - m) ** 2, axis=-1, keepdims=True)
        return (z - m) / jnp.sqrt(var + 1e-5) * w + b

    x1 = ln(x + attn, params["ln1w"], params["ln1b"])
    h = jax.nn.relu(x1 @ params["w1"].T + params["b1"])
    h = h @ params["w2"].T + params["b2"]
    x2 = ln(x1 + h, params["ln2w"], params["ln2b"])
    return jnp.transpose(x2, (1, 0, 2))


def make_params(key, embed_dim):
    E = embed_dim
    H = 4 * E
    keys = jax.random.split(key, 8)
    scale_in = 1.0 / (E ** 0.5)
    scale_h = 1.0 / (H ** 0.5)
    in_proj_w = jax.random.normal(keys[0], (3 * E, E), jnp.float32) * scale_in
    in_proj_b = jax.random.normal(keys[1], (3 * E,), jnp.float32) * 0.02
    return {
        "wq": in_proj_w[:E], "wk": in_proj_w[E:2 * E], "wv": in_proj_w[2 * E:],
        "bq": in_proj_b[:E].reshape(1, E),
        "bk": in_proj_b[E:2 * E].reshape(1, E),
        "bv": in_proj_b[2 * E:].reshape(1, E),
        "wo": jax.random.normal(keys[2], (E, E), jnp.float32) * scale_in,
        "bo": (jax.random.normal(keys[3], (E,), jnp.float32) * 0.02).reshape(1, E),
        "ln1w": jnp.ones((1, E), jnp.float32),
        "ln1b": jnp.zeros((1, E), jnp.float32),
        "w1": jax.random.normal(keys[4], (H, E), jnp.float32) * scale_in,
        "b1": (jax.random.normal(keys[5], (H,), jnp.float32) * 0.02).reshape(1, H),
        "w2": jax.random.normal(keys[6], (E, H), jnp.float32) * scale_h,
        "b2": (jax.random.normal(keys[7], (E,), jnp.float32) * 0.02).reshape(1, E),
        "ln2w": jnp.ones((1, E), jnp.float32),
        "ln2b": jnp.zeros((1, E), jnp.float32),
    }


if __name__ == "__main__":
    seq, batch, embed_dim, num_heads = 8, 2, 32, 4

    key = jax.random.PRNGKey(0)
    kx, kp = jax.random.split(key)
    x = jax.random.normal(kx, (seq, batch, embed_dim), jnp.float32)
    params = make_params(kp, embed_dim)

    out = gpt_block_forward(x, params, num_heads)
    out = jax.block_until_ready(out)

    ref = _reference_forward(x, params, num_heads)
    assert out.shape == (seq, batch, embed_dim)
    # bf16 matmul operands (with f32 accumulation and f32 LayerNorm/softmax
    # stats) loosen the match vs the pure-f32 reference; structural bugs would
    # show up as O(1) errors.
    assert jnp.allclose(out, ref, atol=1e-1, rtol=1e-1), "mismatch vs JAX reference"

    print("KERNEL_OK")
</pallas_src>

<mosaic_0001>
module attributes {stable_mosaic.version = 11 : i64} {
  func.func @gpt_block_kernel(%arg0: i32, %arg1: i32, %arg2: memref<1x8x32xf32, #tpu.memory_space<vmem>>, %arg3: memref<32x32xbf16, #tpu.memory_space<vmem>>, %arg4: memref<1x32xf32, #tpu.memory_space<vmem>>, %arg5: memref<32x64xbf16, #tpu.memory_space<vmem>>, %arg6: memref<1x64xf32, #tpu.memory_space<vmem>>, %arg7: memref<32x32xbf16, #tpu.memory_space<vmem>>, %arg8: memref<1x32xf32, #tpu.memory_space<vmem>>, %arg9: memref<1x32xf32, #tpu.memory_space<vmem>>, %arg10: memref<1x32xf32, #tpu.memory_space<vmem>>, %arg11: memref<32x128xbf16, #tpu.memory_space<vmem>>, %arg12: memref<1x128xf32, #tpu.memory_space<vmem>>, %arg13: memref<128x32xbf16, #tpu.memory_space<vmem>>, %arg14: memref<1x32xf32, #tpu.memory_space<vmem>>, %arg15: memref<1x32xf32, #tpu.memory_space<vmem>>, %arg16: memref<1x32xf32, #tpu.memory_space<vmem>>, %arg17: memref<1x8x32xf32, #tpu.memory_space<vmem>>, %arg18: memref<8x32xbf16, #tpu.memory_space<vmem>>, %arg19: memref<8x32xbf16, #tpu.memory_space<vmem>>, %arg20: memref<8x32xbf16, #tpu.memory_space<vmem>>) attributes {dimension_semantics = [#tpu.dimension_semantics<parallel>, #tpu.dimension_semantics<arbitrary>], iteration_bounds = array<i64: 2, 1>, scalar_prefetch = 0 : i64, scratch_operands = 3 : i64, tpu.core_type = #tpu.core_type<tc>, window_params = [{transform_indices = @transform_0, window_bounds = array<i64: 1, 8, 32>}, {pipeline_mode = #tpu.pipeline_mode<synchronous>, transform_indices = @transform_1, window_bounds = array<i64: 32, 32>}, {pipeline_mode = #tpu.pipeline_mode<synchronous>, transform_indices = @transform_2, window_bounds = array<i64: 1, 32>}, {pipeline_mode = #tpu.pipeline_mode<synchronous>, transform_indices = @transform_3, window_bounds = array<i64: 32, 64>}, {pipeline_mode = #tpu.pipeline_mode<synchronous>, transform_indices = @transform_4, window_bounds = array<i64: 1, 64>}, {pipeline_mode = #tpu.pipeline_mode<synchronous>, transform_indices = @transform_5, window_bounds = array<i64: 32, 32>}, {pipeline_mode = #tpu.pipeline_mode<synchronous>, transform_indices = @transform_6, window_bounds = array<i64: 1, 32>}, {pipeline_mode = #tpu.pipeline_mode<synchronous>, transform_indices = @transform_7, window_bounds = array<i64: 1, 32>}, {pipeline_mode = #tpu.pipeline_mode<synchronous>, transform_indices = @transform_8, window_bounds = array<i64: 1, 32>}, {pipeline_mode = #tpu.pipeline_mode<synchronous>, transform_indices = @transform_9, window_bounds = array<i64: 32, 128>}, {pipeline_mode = #tpu.pipeline_mode<synchronous>, transform_indices = @transform_10, window_bounds = array<i64: 1, 128>}, {pipeline_mode = #tpu.pipeline_mode<synchronous>, transform_indices = @transform_11, window_bounds = array<i64: 128, 32>}, {pipeline_mode = #tpu.pipeline_mode<synchronous>, transform_indices = @transform_12, window_bounds = array<i64: 1, 32>}, {pipeline_mode = #tpu.pipeline_mode<synchronous>, transform_indices = @transform_13, window_bounds = array<i64: 1, 32>}, {pipeline_mode = #tpu.pipeline_mode<synchronous>, transform_indices = @transform_14, window_bounds = array<i64: 1, 32>}, {transform_indices = @transform_15, window_bounds = array<i64: 1, 8, 32>}]} {
    %c0_i32 = arith.constant 0 : i32
    %0 = arith.cmpi eq, %arg1, %c0_i32 : i32
    %1 = arith.extui %0 : i1 to i32
    %c0_i32_0 = arith.constant 0 : i32
    %2 = arith.cmpi ne, %1, %c0_i32_0 : i32
    scf.if %2 {
      %c0_71 = arith.constant 0 : index
      %c0_72 = arith.constant 0 : index
      %c0_73 = arith.constant 0 : index
      %164 = vector.load %arg2[%c0_71, %c0_72, %c0_73] : memref<1x8x32xf32, #tpu.memory_space<vmem>>, vector<1x8x32xf32>
      %165 = vector.shape_cast %164 : vector<1x8x32xf32> to vector<8x32xf32>
      %166 = arith.truncf %165 : vector<8x32xf32> to vector<8x32xbf16>
      %c0_74 = arith.constant 0 : index
      %c0_75 = arith.constant 0 : index
      %167 = vector.load %arg5[%c0_74, %c0_75] : memref<32x64xbf16, #tpu.memory_space<vmem>>, vector<32x64xbf16>
      %cst_76 = arith.constant dense<0.000000e+00> : vector<8x64xf32>
      %168 = tpu.matmul %166, %167, %cst_76 {dimension_numbers = #tpu.dot_dimension_numbers<[1], [0], [0], [1], [0, 0, 1, 1], [], []>} : vector<8x32xbf16>, vector<32x64xbf16>, vector<8x64xf32> -> vector<8x64xf32>
      %c0_77 = arith.constant 0 : index
      %c0_78 = arith.constant 0 : index
      %169 = vector.load %arg6[%c0_77, %c0_78] : memref<1x64xf32, #tpu.memory_space<vmem>>, vector<1x64xf32>
      %170 = vector.broadcast %169 : vector<1x64xf32> to vector<8x64xf32>
      %171 = arith.addf %168, %170 : vector<8x64xf32>
      %172 = vector.extract_strided_slice %171 {offsets = [0, 0], sizes = [8, 32], strides = [1, 1]} : vector<8x64xf32> to vector<8x32xf32>
      %173 = arith.truncf %172 : vector<8x32xf32> to vector<8x32xbf16>
      %c0_79 = arith.constant 0 : index
      %c0_80 = arith.constant 0 : index
      %174 = vector.load %arg18[%c0_79, %c0_80] : memref<8x32xbf16, #tpu.memory_space<vmem>>, vector<8x32xbf16>
      tpu.vector_store %arg18[%c0_79, %c0_80], %173 {strides = array<i32>} : memref<8x32xbf16, #tpu.memory_space<vmem>>, vector<8x32xbf16>,
      %175 = vector.extract_strided_slice %171 {offsets = [0, 32], sizes = [8, 32], strides = [1, 1]} : vector<8x64xf32> to vector<8x32xf32>
      %176 = arith.truncf %175 : vector<8x32xf32> to vector<8x32xbf16>
      %c0_81 = arith.constant 0 : index
      %c0_82 = arith.constant 0 : index
      %177 = vector.load %arg19[%c0_81, %c0_82] : memref<8x32xbf16, #tpu.memory_space<vmem>>, vector<8x32xbf16>
      tpu.vector_store %arg19[%c0_81, %c0_82], %176 {strides = array<i32>} : memref<8x32xbf16, #tpu.memory_space<vmem>>, vector<8x32xbf16>,
    } else {
    }
    %c8_i32 = arith.constant 8 : i32
    %3 = arith.muli %arg1, %c8_i32 : i32
    %4 = tpu.assume_multiple %3, 8 : i32
    %c0 = arith.constant 0 : index
    %5 = arith.index_cast %4 : i32 to index
    %c0_1 = arith.constant 0 : index
    %6 = vector.load %arg2[%c0, %5, %c0_1] : memref<1x8x32xf32, #tpu.memory_space<vmem>>, vector<1x8x32xf32>
    %7 = vector.shape_cast %6 : vector<1x8x32xf32> to vector<8x32xf32>
    %8 = arith.truncf %7 : vector<8x32xf32> to vector<8x32xbf16>
    %c0_2 = arith.constant 0 : index
    %c0_3 = arith.constant 0 : index
    %9 = vector.load %arg3[%c0_2, %c0_3] : memref<32x32xbf16, #tpu.memory_space<vmem>>, vector<32x32xbf16>
    %cst = arith.constant dense<0.000000e+00> : vector<8x32xf32>
    %10 = tpu.matmul %8, %9, %cst {dimension_numbers = #tpu.dot_dimension_numbers<[1], [0], [0], [1], [0, 0, 1, 1], [], []>} : vector<8x32xbf16>, vector<32x32xbf16>, vector<8x32xf32> -> vector<8x32xf32>
    %c0_4 = arith.constant 0 : index
    %c0_5 = arith.constant 0 : index
    %11 = vector.load %arg4[%c0_4, %c0_5] : memref<1x32xf32, #tpu.memory_space<vmem>>, vector<1x32xf32>
    %12 = vector.broadcast %11 : vector<1x32xf32> to vector<8x32xf32>
    %13 = arith.addf %10, %12 : vector<8x32xf32>
    %cst_6 = arith.constant 0.353553385 : f32
    %14 = vector.broadcast %cst_6 : f32 to vector<8x32xf32>
    %15 = arith.mulf %13, %14 : vector<8x32xf32>
    %16 = arith.truncf %15 : vector<8x32xf32> to vector<8x32xbf16>
    %c0_7 = arith.constant 0 : index
    %c0_8 = arith.constant 0 : index
    %17 = vector.load %arg18[%c0_7, %c0_8] : memref<8x32xbf16, #tpu.memory_space<vmem>>, vector<8x32xbf16>
    %c0_9 = arith.constant 0 : index
    %c0_10 = arith.constant 0 : index
    %18 = vector.load %arg19[%c0_9, %c0_10] : memref<8x32xbf16, #tpu.memory_space<vmem>>, vector<8x32xbf16>
    %19 = vector.extract_strided_slice %16 {offsets = [0, 0], sizes = [8, 8], strides = [1, 1]} : vector<8x32xbf16> to vector<8x8xbf16>
    %20 = vector.extract_strided_slice %17 {offsets = [0, 0], sizes = [8, 8], strides = [1, 1]} : vector<8x32xbf16> to vector<8x8xbf16>
    %21 = vector.extract_strided_slice %18 {offsets = [0, 0], sizes = [8, 8], strides = [1, 1]} : vector<8x32xbf16> to vector<8x8xbf16>
    %cst_11 = arith.constant dense<0.000000e+00> : vector<8x8xf32>
    %22 = tpu.matmul %19, %20, %cst_11 {dimension_numbers = #tpu.dot_dimension_numbers<[1], [1], [0], [0], [0, 0, 1, 0], [], []>} : vector<8x8xbf16>, vector<8x8xbf16>, vector<8x8xf32> -> vector<8x8xf32>
    %cst_12 = arith.constant dense<0xFF800000> : vector<8xf32>
    %23 = vector.multi_reduction <maximumf>, %22, %cst_12 [1] : vector<8x8xf32> to vector<8xf32>
    %24 = vector.shape_cast %23 : vector<8xf32> to vector<8x1xf32>
    %25 = vector.broadcast %24 : vector<8x1xf32> to vector<8x8xf32>
    %26 = arith.subf %22, %25 : vector<8x8xf32>
    %27 = math.exp %26 : vector<8x8xf32>
    %cst_13 = arith.constant dense<0.000000e+00> : vector<8xf32>
    %28 = vector.multi_reduction <add>, %27, %cst_13 [1] : vector<8x8xf32> to vector<8xf32>
    %29 = vector.shape_cast %28 : vector<8xf32> to vector<8x1xf32>
    %30 = tpu.reciprocal %29 {approx = true} : vector<8x1xf32> -> vector<8x1xf32>
    %31 = vector.broadcast %30 : vector<8x1xf32> to vector<8x8xf32>
    %32 = arith.mulf %27, %31 : vector<8x8xf32>
    %33 = arith.truncf %32 : vector<8x8xf32> to vector<8x8xbf16>
    %cst_14 = arith.constant dense<0.000000e+00> : vector<8x8xf32>
    %34 = tpu.matmul %33, %21, %cst_14 {dimension_numbers = #tpu.dot_dimension_numbers<[1], [0], [0], [1], [0, 0, 1, 1], [], []>} : vector<8x8xbf16>, vector<8x8xbf16>, vector<8x8xf32> -> vector<8x8xf32>
    %35 = arith.truncf %34 : vector<8x8xf32> to vector<8x8xbf16>
    %c0_15 = arith.constant 0 : index
    %c0_16 = arith.constant 0 : index
    %36 = vector.load %arg20[%c0_15, %c0_16] : memref<8x32xbf16, #tpu.memory_space<vmem>>, vector<8x8xbf16>
    tpu.vector_store %arg20[%c0_15, %c0_16], %35 {strides = array<i32>} : memref<8x32xbf16, #tpu.memory_space<vmem>>, vector<8x8xbf16>,
    %37 = vector.extract_strided_slice %16 {offsets = [0, 8], sizes = [8, 8], strides = [1, 1]} : vector<8x32xbf16> to vector<8x8xbf16>
    %38 = vector.extract_strided_slice %17 {offsets = [0, 8], sizes = [8, 8], strides = [1, 1]} : vector<8x32xbf16> to vector<8x8xbf16>
    %39 = vector.extract_strided_slice %18 {offsets = [0, 8], sizes = [8, 8], strides = [1, 1]} : vector<8x32xbf16> to vector<8x8xbf16>
    %cst_17 = arith.constant dense<0.000000e+00> : vector<8x8xf32>
    %40 = tpu.matmul %37, %38, %cst_17 {dimension_numbers = #tpu.dot_dimension_numbers<[1], [1], [0], [0], [0, 0, 1, 0], [], []>} : vector<8x8xbf16>, vector<8x8xbf16>, vector<8x8xf32> -> vector<8x8xf32>
    %cst_18 = arith.constant dense<0xFF800000> : vector<8xf32>
    %41 = vector.multi_reduction <maximumf>, %40, %cst_18 [1] : vector<8x8xf32> to vector<8xf32>
    %42 = vector.shape_cast %41 : vector<8xf32> to vector<8x1xf32>
    %43 = vector.broadcast %42 : vector<8x1xf32> to vector<8x8xf32>
    %44 = arith.subf %40, %43 : vector<8x8xf32>
    %45 = math.exp %44 : vector<8x8xf32>
    %cst_19 = arith.constant dense<0.000000e+00> : vector<8xf32>
    %46 = vector.multi_reduction <add>, %45, %cst_19 [1] : vector<8x8xf32> to vector<8xf32>
    %47 = vector.shape_cast %46 : vector<8xf32> to vector<8x1xf32>
    %48 = tpu.reciprocal %47 {approx = true} : vector<8x1xf32> -> vector<8x1xf32>
    %49 = vector.broadcast %48 : vector<8x1xf32> to vector<8x8xf32>
    %50 = arith.mulf %45, %49 : vector<8x8xf32>
    %51 = arith.truncf %50 : vector<8x8xf32> to vector<8x8xbf16>
    %cst_20 = arith.constant dense<0.000000e+00> : vector<8x8xf32>
    %52 = tpu.matmul %51, %39, %cst_20 {dimension_numbers = #tpu.dot_dimension_numbers<[1], [0], [0], [1], [0, 0, 1, 1], [], []>} : vector<8x8xbf16>, vector<8x8xbf16>, vector<8x8xf32> -> vector<8x8xf32>
    %53 = arith.truncf %52 : vector<8x8xf32> to vector<8x8xbf16>
    %c0_21 = arith.constant 0 : index
    %c8 = arith.constant 8 : index
    %54 = vector.load %arg20[%c0_21, %c8] : memref<8x32xbf16, #tpu.memory_space<vmem>>, vector<8x8xbf16>
    tpu.vector_store %arg20[%c0_21, %c8], %53 {strides = array<i32>} : memref<8x32xbf16, #tpu.memory_space<vmem>>, vector<8x8xbf16>,
    %55 = vector.extract_strided_slice %16 {offsets = [0, 16], sizes = [8, 8], strides = [1, 1]} : vector<8x32xbf16> to vector<8x8xbf16>
    %56 = vector.extract_strided_slice %17 {offsets = [0, 16], sizes = [8, 8], strides = [1, 1]} : vector<8x32xbf16> to vector<8x8xbf16>
    %57 = vector.extract_strided_slice %18 {offsets = [0, 16], sizes = [8, 8], strides = [1, 1]} : vector<8x32xbf16> to vector<8x8xbf16>
    %cst_22 = arith.constant dense<0.000000e+00> : vector<8x8xf32>
    %58 = tpu.matmul %55, %56, %cst_22 {dimension_numbers = #tpu.dot_dimension_numbers<[1], [1], [0], [0], [0, 0, 1, 0], [], []>} : vector<8x8xbf16>, vector<8x8xbf16>, vector<8x8xf32> -> vector<8x8xf32>
    %cst_23 = arith.constant dense<0xFF800000> : vector<8xf32>
    %59 = vector.multi_reduction <maximumf>, %58, %cst_23 [1] : vector<8x8xf32> to vector<8xf32>
    %60 = vector.shape_cast %59 : vector<8xf32> to vector<8x1xf32>
    %61 = vector.broadcast %60 : vector<8x1xf32> to vector<8x8xf32>
    %62 = arith.subf %58, %61 : vector<8x8xf32>
    %63 = math.exp %62 : vector<8x8xf32>
    %cst_24 = arith.constant dense<0.000000e+00> : vector<8xf32>
    %64 = vector.multi_reduction <add>, %63, %cst_24 [1] : vector<8x8xf32> to vector<8xf32>
    %65 = vector.shape_cast %64 : vector<8xf32> to vector<8x1xf32>
    %66 = tpu.reciprocal %65 {approx = true} : vector<8x1xf32> -> vector<8x1xf32>
    %67 = vector.broadcast %66 : vector<8x1xf32> to vector<8x8xf32>
    %68 = arith.mulf %63, %67 : vector<8x8xf32>
    %69 = arith.truncf %68 : vector<8x8xf32> to vector<8x8xbf16>
    %cst_25 = arith.constant dense<0.000000e+00> : vector<8x8xf32>
    %70 = tpu.matmul %69, %57, %cst_25 {dimension_numbers = #tpu.dot_dimension_numbers<[1], [0], [0], [1], [0, 0, 1, 1], [], []>} : vector<8x8xbf16>, vector<8x8xbf16>, vector<8x8xf32> -> vector<8x8xf32>
    %71 = arith.truncf %70 : vector<8x8xf32> to vector<8x8xbf16>
    %c0_26 = arith.constant 0 : index
    %c16 = arith.constant 16 : index
    %72 = vector.load %arg20[%c0_26, %c16] : memref<8x32xbf16, #tpu.memory_space<vmem>>, vector<8x8xbf16>
    tpu.vector_store %arg20[%c0_26, %c16], %71 {strides = array<i32>} : memref<8x32xbf16, #tpu.memory_space<vmem>>, vector<8x8xbf16>,
    %73 = vector.extract_strided_slice %16 {offsets = [0, 24], sizes = [8, 8], strides = [1, 1]} : vector<8x32xbf16> to vector<8x8xbf16>
    %74 = vector.extract_strided_slice %17 {offsets = [0, 24], sizes = [8, 8], strides = [1, 1]} : vector<8x32xbf16> to vector<8x8xbf16>
    %75 = vector.extract_strided_slice %18 {offsets = [0, 24], sizes = [8, 8], strides = [1, 1]} : vector<8x32xbf16> to vector<8x8xbf16>
    %cst_27 = arith.constant dense<0.000000e+00> : vector<8x8xf32>
    %76 = tpu.matmul %73, %74, %cst_27 {dimension_numbers = #tpu.dot_dimension_numbers<[1], [1], [0], [0], [0, 0, 1, 0], [], []>} : vector<8x8xbf16>, vector<8x8xbf16>, vector<8x8xf32> -> vector<8x8xf32>
    %cst_28 = arith.constant dense<0xFF800000> : vector<8xf32>
    %77 = vector.multi_reduction <maximumf>, %76, %cst_28 [1] : vector<8x8xf32> to vector<8xf32>
    %78 = vector.shape_cast %77 : vector<8xf32> to vector<8x1xf32>
    %79 = vector.broadcast %78 : vector<8x1xf32> to vector<8x8xf32>
    %80 = arith.subf %76, %79 : vector<8x8xf32>
    %81 = math.exp %80 : vector<8x8xf32>
    %cst_29 = arith.constant dense<0.000000e+00> : vector<8xf32>
    %82 = vector.multi_reduction <add>, %81, %cst_29 [1] : vector<8x8xf32> to vector<8xf32>
    %83 = vector.shape_cast %82 : vector<8xf32> to vector<8x1xf32>
    %84 = tpu.reciprocal %83 {approx = true} : vector<8x1xf32> -> vector<8x1xf32>
    %85 = vector.broadcast %84 : vector<8x1xf32> to vector<8x8xf32>
    %86 = arith.mulf %81, %85 : vector<8x8xf32>
    %87 = arith.truncf %86 : vector<8x8xf32> to vector<8x8xbf16>
    %cst_30 = arith.constant dense<0.000000e+00> : vector<8x8xf32>
    %88 = tpu.matmul %87, %75, %cst_30 {dimension_numbers = #tpu.dot_dimension_numbers<[1], [0], [0], [1], [0, 0, 1, 1], [], []>} : vector<8x8xbf16>, vector<8x8xbf16>, vector<8x8xf32> -> vector<8x8xf32>
    %89 = arith.truncf %88 : vector<8x8xf32> to vector<8x8xbf16>
    %c0_31 = arith.constant 0 : index
    %c24 = arith.constant 24 : index
    %90 = vector.load %arg20[%c0_31, %c24] : memref<8x32xbf16, #tpu.memory_space<vmem>>, vector<8x8xbf16>
    tpu.vector_store %arg20[%c0_31, %c24], %89 {strides = array<i32>} : memref<8x32xbf16, #tpu.memory_space<vmem>>, vector<8x8xbf16>,
    %c0_32 = arith.constant 0 : index
    %c0_33 = arith.constant 0 : index
    %91 = vector.load %arg20[%c0_32, %c0_33] : memref<8x32xbf16, #tpu.memory_space<vmem>>, vector<8x32xbf16>
    %c0_34 = arith.constant 0 : index
    %c0_35 = arith.constant 0 : index
    %92 = vector.load %arg7[%c0_34, %c0_35] : memref<32x32xbf16, #tpu.memory_space<vmem>>, vector<32x32xbf16>
    %cst_36 = arith.constant dense<0.000000e+00> : vector<8x32xf32>
    %93 = tpu.matmul %91, %92, %cst_36 {dimension_numbers = #tpu.dot_dimension_numbers<[1], [0], [0], [1], [0, 0, 1, 1], [], []>} : vector<8x32xbf16>, vector<32x32xbf16>, vector<8x32xf32> -> vector<8x32xf32>
    %c0_37 = arith.constant 0 : index
    %c0_38 = arith.constant 0 : index
    %94 = vector.load %arg8[%c0_37, %c0_38] : memref<1x32xf32, #tpu.memory_space<vmem>>, vector<1x32xf32>
    %95 = vector.broadcast %94 : vector<1x32xf32> to vector<8x32xf32>
    %96 = arith.addf %93, %95 : vector<8x32xf32>
    %97 = arith.addf %7, %96 : vector<8x32xf32>
    %c0_39 = arith.constant 0 : index
    %c0_40 = arith.constant 0 : index
    %98 = vector.load %arg9[%c0_39, %c0_40] : memref<1x32xf32, #tpu.memory_space<vmem>>, vector<1x32xf32>
    %c0_41 = arith.constant 0 : index
    %c0_42 = arith.constant 0 : index
    %99 = vector.load %arg10[%c0_41, %c0_42] : memref<1x32xf32, #tpu.memory_space<vmem>>, vector<1x32xf32>
    %cst_43 = arith.constant dense<0.000000e+00> : vector<8xf32>
    %100 = vector.multi_reduction <add>, %97, %cst_43 [1] : vector<8x32xf32> to vector<8xf32>
    %101 = vector.shape_cast %100 : vector<8xf32> to vector<8x1xf32>
    %cst_44 = arith.constant 3.200000e+01 : f32
    %102 = vector.broadcast %cst_44 : f32 to vector<8x1xf32>
    %103 = arith.divf %101, %102 : vector<8x1xf32>
    %104 = vector.broadcast %103 : vector<8x1xf32> to vector<8x32xf32>
    %105 = arith.subf %97, %104 : vector<8x32xf32>
    %106 = arith.mulf %105, %105 : vector<8x32xf32>
    %cst_45 = arith.constant dense<0.000000e+00> : vector<8xf32>
    %107 = vector.multi_reduction <add>, %106, %cst_45 [1] : vector<8x32xf32> to vector<8xf32>
    %108 = vector.shape_cast %107 : vector<8xf32> to vector<8x1xf32>
    %cst_46 = arith.constant 3.200000e+01 : f32
    %109 = vector.broadcast %cst_46 : f32 to vector<8x1xf32>
    %110 = arith.divf %108, %109 : vector<8x1xf32>
    %111 = vector.broadcast %103 : vector<8x1xf32> to vector<8x32xf32>
    %112 = arith.subf %97, %111 : vector<8x32xf32>
    %cst_47 = arith.constant 9.99999974E-6 : f32
    %113 = vector.broadcast %cst_47 : f32 to vector<8x1xf32>
    %114 = arith.addf %110, %113 : vector<8x1xf32>
    %115 = math.rsqrt %114 : vector<8x1xf32>
    %116 = vector.broadcast %115 : vector<8x1xf32> to vector<8x32xf32>
    %117 = arith.mulf %112, %116 : vector<8x32xf32>
    %118 = vector.broadcast %98 : vector<1x32xf32> to vector<8x32xf32>
    %119 = arith.mulf %117, %118 : vector<8x32xf32>
    %120 = vector.broadcast %99 : vector<1x32xf32> to vector<8x32xf32>
    %121 = arith.addf %119, %120 : vector<8x32xf32>
    %122 = arith.truncf %121 : vector<8x32xf32> to vector<8x32xbf16>
    %c0_48 = arith.constant 0 : index
    %c0_49 = arith.constant 0 : index
    %123 = vector.load %arg11[%c0_48, %c0_49] : memref<32x128xbf16, #tpu.memory_space<vmem>>, vector<32x128xbf16>
    %cst_50 = arith.constant dense<0.000000e+00> : vector<8x128xf32>
    %124 = tpu.matmul %122, %123, %cst_50 {dimension_numbers = #tpu.dot_dimension_numbers<[1], [0], [0], [1], [0, 0, 1, 1], [], []>} : vector<8x32xbf16>, vector<32x128xbf16>, vector<8x128xf32> -> vector<8x128xf32>
    %c0_51 = arith.constant 0 : index
    %c0_52 = arith.constant 0 : index
    %125 = vector.load %arg12[%c0_51, %c0_52] : memref<1x128xf32, #tpu.memory_space<vmem>>, vector<1x128xf32>
    %126 = vector.broadcast %125 : vector<1x128xf32> to vector<8x128xf32>
    %127 = arith.addf %124, %126 : vector<8x128xf32>
    %cst_53 = arith.constant 0.000000e+00 : f32
    %128 = vector.broadcast %cst_53 : f32 to vector<8x128xf32>
    %129 = arith.maximumf %127, %128 : vector<8x128xf32>
    %130 = arith.truncf %129 : vector<8x128xf32> to vector<8x128xbf16>
    %c0_54 = arith.constant 0 : index
    %c0_55 = arith.constant 0 : index
    %131 = vector.load %arg13[%c0_54, %c0_55] : memref<128x32xbf16, #tpu.memory_space<vmem>>, vector<128x32xbf16>
    %cst_56 = arith.constant dense<0.000000e+00> : vector<8x32xf32>
    %132 = tpu.matmul %130, %131, %cst_56 {dimension_numbers = #tpu.dot_dimension_numbers<[1], [0], [0], [1], [0, 0, 1, 1], [], []>} : vector<8x128xbf16>, vector<128x32xbf16>, vector<8x32xf32> -> vector<8x32xf32>
    %c0_57 = arith.constant 0 : index
    %c0_58 = arith.constant 0 : index
    %133 = vector.load %arg14[%c0_57, %c0_58] : memref<1x32xf32, #tpu.memory_space<vmem>>, vector<1x32xf32>
    %134 = vector.broadcast %133 : vector<1x32xf32> to vector<8x32xf32>
    %135 = arith.addf %132, %134 : vector<8x32xf32>
    %136 = arith.addf %121, %135 : vector<8x32xf32>
    %c0_59 = arith.constant 0 : index
    %c0_60 = arith.constant 0 : index
    %137 = vector.load %arg15[%c0_59, %c0_60] : memref<1x32xf32, #tpu.memory_space<vmem>>, vector<1x32xf32>
    %c0_61 = arith.constant 0 : index
    %c0_62 = arith.constant 0 : index
    %138 = vector.load %arg16[%c0_61, %c0_62] : memref<1x32xf32, #tpu.memory_space<vmem>>, vector<1x32xf32>
    %cst_63 = arith.constant dense<0.000000e+00> : vector<8xf32>
    %139 = vector.multi_reduction <add>, %136, %cst_63 [1] : vector<8x32xf32> to vector<8xf32>
    %140 = vector.shape_cast %139 : vector<8xf32> to vector<8x1xf32>
    %cst_64 = arith.constant 3.200000e+01 : f32
    %141 = vector.broadcast %cst_64 : f32 to vector<8x1xf32>
    %142 = arith.divf %140, %141 : vector<8x1xf32>
    %143 = vector.broadcast %142 : vector<8x1xf32> to vector<8x32xf32>
    %144 = arith.subf %136, %143 : vector<8x32xf32>
    %145 = arith.mulf %144, %144 : vector<8x32xf32>
    %cst_65 = arith.constant dense<0.000000e+00> : vector<8xf32>
    %146 = vector.multi_reduction <add>, %145, %cst_65 [1] : vector<8x32xf32> to vector<8xf32>
    %147 = vector.shape_cast %146 : vector<8xf32> to vector<8x1xf32>
    %cst_66 = arith.constant 3.200000e+01 : f32
    %148 = vector.broadcast %cst_66 : f32 to vector<8x1xf32>
    %149 = arith.divf %147, %148 : vector<8x1xf32>
    %150 = vector.broadcast %142 : vector<8x1xf32> to vector<8x32xf32>
    %151 = arith.subf %136, %150 : vector<8x32xf32>
    %cst_67 = arith.constant 9.99999974E-6 : f32
    %152 = vector.broadcast %cst_67 : f32 to vector<8x1xf32>
    %153 = arith.addf %149, %152 : vector<8x1xf32>
    %154 = math.rsqrt %153 : vector<8x1xf32>
    %155 = vector.broadcast %154 : vector<8x1xf32> to vector<8x32xf32>
    %156 = arith.mulf %151, %155 : vector<8x32xf32>
    %157 = vector.broadcast %137 : vector<1x32xf32> to vector<8x32xf32>
    %158 = arith.mulf %156, %157 : vector<8x32xf32>
    %159 = vector.broadcast %138 : vector<1x32xf32> to vector<8x32xf32>
    %160 = arith.addf %158, %159 : vector<8x32xf32>
    %c0_68 = arith.constant 0 : index
    %c0_69 = arith.constant 0 : index
    %c0_70 = arith.constant 0 : index
    %161 = vector.load %arg17[%c0_68, %c0_69, %c0_70] : memref<1x8x32xf32, #tpu.memory_space<vmem>>, vector<1x8x32xf32>
    %162 = vector.shape_cast %161 : vector<1x8x32xf32> to vector<8x32xf32>
    %163 = vector.shape_cast %160 : vector<8x32xf32> to vector<1x8x32xf32>
    tpu.vector_store %arg17[%c0_68, %c0_69, %c0_70], %163 {strides = array<i32>} : memref<1x8x32xf32, #tpu.memory_space<vmem>>, vector<1x8x32xf32>,
    return
  }
  func.func @transform_0(%arg0: i32, %arg1: i32) -> (i32, i32, i32) {
    %c0_i32 = arith.constant 0 : i32
    %c0_i32_0 = arith.constant 0 : i32
    %c0_i32_1 = arith.constant 0 : i32
    return %arg0, %c0_i32, %c0_i32_0 : i32, i32, i32
  }
  func.func @transform_1(%arg0: i32, %arg1: i32) -> (i32, i32) {
    %c0_i32 = arith.constant 0 : i32
    %c0_i32_0 = arith.constant 0 : i32
    %c0_i32_1 = arith.constant 0 : i32
    return %c0_i32, %c0_i32_0 : i32, i32
  }
  func.func @transform_2(%arg0: i32, %arg1: i32) -> (i32, i32) {
    %c0_i32 = arith.constant 0 : i32
    %c0_i32_0 = arith.constant 0 : i32
    %c0_i32_1 = arith.constant 0 : i32
    return %c0_i32, %c0_i32_0 : i32, i32
  }
  func.func @transform_3(%arg0: i32, %arg1: i32) -> (i32, i32) {
    %c0_i32 = arith.constant 0 : i32
    %c0_i32_0 = arith.constant 0 : i32
    %c0_i32_1 = arith.constant 0 : i32
    return %c0_i32, %c0_i32_0 : i32, i32
  }
  func.func @transform_4(%arg0: i32, %arg1: i32) -> (i32, i32) {
    %c0_i32 = arith.constant 0 : i32
    %c0_i32_0 = arith.constant 0 : i32
    %c0_i32_1 = arith.constant 0 : i32
    return %c0_i32, %c0_i32_0 : i32, i32
  }
  func.func @transform_5(%arg0: i32, %arg1: i32) -> (i32, i32) {
    %c0_i32 = arith.constant 0 : i32
    %c0_i32_0 = arith.constant 0 : i32
    %c0_i32_1 = arith.constant 0 : i32
    return %c0_i32, %c0_i32_0 : i32, i32
  }
  func.func @transform_6(%arg0: i32, %arg1: i32) -> (i32, i32) {
    %c0_i32 = arith.constant 0 : i32
    %c0_i32_0 = arith.constant 0 : i32
    %c0_i32_1 = arith.constant 0 : i32
    return %c0_i32, %c0_i32_0 : i32, i32
  }
  func.func @transform_7(%arg0: i32, %arg1: i32) -> (i32, i32) {
    %c0_i32 = arith.constant 0 : i32
    %c0_i32_0 = arith.constant 0 : i32
    %c0_i32_1 = arith.constant 0 : i32
    return %c0_i32, %c0_i32_0 : i32, i32
  }
  func.func @transform_8(%arg0: i32, %arg1: i32) -> (i32, i32) {
    %c0_i32 = arith.constant 0 : i32
    %c0_i32_0 = arith.constant 0 : i32
    %c0_i32_1 = arith.constant 0 : i32
    return %c0_i32, %c0_i32_0 : i32, i32
  }
  func.func @transform_9(%arg0: i32, %arg1: i32) -> (i32, i32) {
    %c0_i32 = arith.constant 0 : i32
    %c0_i32_0 = arith.constant 0 : i32
    %c0_i32_1 = arith.constant 0 : i32
    return %c0_i32, %c0_i32_0 : i32, i32
  }
  func.func @transform_10(%arg0: i32, %arg1: i32) -> (i32, i32) {
    %c0_i32 = arith.constant 0 : i32
    %c0_i32_0 = arith.constant 0 : i32
    %c0_i32_1 = arith.constant 0 : i32
    return %c0_i32, %c0_i32_0 : i32, i32
  }
  func.func @transform_11(%arg0: i32, %arg1: i32) -> (i32, i32) {
    %c0_i32 = arith.constant 0 : i32
    %c0_i32_0 = arith.constant 0 : i32
    %c0_i32_1 = arith.constant 0 : i32
    return %c0_i32, %c0_i32_0 : i32, i32
  }
  func.func @transform_12(%arg0: i32, %arg1: i32) -> (i32, i32) {
    %c0_i32 = arith.constant 0 : i32
    %c0_i32_0 = arith.constant 0 : i32
    %c0_i32_1 = arith.constant 0 : i32
    return %c0_i32, %c0_i32_0 : i32, i32
  }
  func.func @transform_13(%arg0: i32, %arg1: i32) -> (i32, i32) {
    %c0_i32 = arith.constant 0 : i32
    %c0_i32_0 = arith.constant 0 : i32
    %c0_i32_1 = arith.constant 0 : i32
    return %c0_i32, %c0_i32_0 : i32, i32
  }
  func.func @transform_14(%arg0: i32, %arg1: i32) -> (i32, i32) {
    %c0_i32 = arith.constant 0 : i32
    %c0_i32_0 = arith.constant 0 : i32
    %c0_i32_1 = arith.constant 0 : i32
    return %c0_i32, %c0_i32_0 : i32, i32
  }
  func.func @transform_15(%arg0: i32, %arg1: i32) -> (i32, i32, i32) {
    %c0_i32 = arith.constant 0 : i32
    %c0_i32_0 = arith.constant 0 : i32
    return %arg0, %arg1, %c0_i32 : i32, i32, i32
  }
}

</mosaic_0001>

<bundles_post_ra>
// kernel: tpu_custom_call.1
= control target key start
LH: loop header
LB: loop body
LE: loop exit
PB: predicated region body
PF: predicated region fallthrough
CT: control target
= control target key end

     0   :  { %s2287_s0 = inlined_call_operand.vmem [shape: f32[2,8,32], index: 0, kind: input, shape index: {}]   ;;  %s2288_s1 = inlined_call_operand.vmem [shape: bf16[32,32], index: 1, kind: input, shape index: {}]   ;;  %s2289_s2 = inlined_call_operand.vmem [shape: f32[1,32], index: 2, kind: input, shape index: {}]   ;;  %s2290_s3 = inlined_call_operand.vmem [shape: bf16[32,64], index: 3, kind: input, shape index: {}]   ;;  %s2291_s4 = inlined_call_operand.vmem [shape: f32[1,64], index: 4, kind: input, shape index: {}]   ;;  %s2292_s5 = inlined_call_operand.vmem [shape: bf16[32,32], index: 5, kind: input, shape index: {}]   ;;  %s2293_s6 = inlined_call_operand.vmem [shape: f32[1,32], index: 6, kind: input, shape index: {}]   ;;  %s2294_s7 = inlined_call_operand.vmem [shape: f32[1,32], index: 7, kind: input, shape index: {}]   ;;  %s2295_s8 = inlined_call_operand.vmem [shape: f32[1,32], index: 8, kind: input, shape index: {}]   ;;  %s2296_s9 = inlined_call_operand.vmem [shape: bf16[32,128], index: 9, kind: input, shape index: {}]   ;;  %s2297_s10 = inlined_call_operand.vmem [shape: f32[1,128], index: 10, kind: input, shape index: {}]   ;;  %s2298_s11 = inlined_call_operand.vmem [shape: bf16[128,32], index: 11, kind: input, shape index: {}]   ;;  %s2299_s12 = inlined_call_operand.vmem [shape: f32[1,32], index: 12, kind: input, shape index: {}]   ;;  %s2300_s13 = inlined_call_operand.vmem [shape: f32[1,32], index: 13, kind: input, shape index: {}]   ;;  %s2301_s14 = inlined_call_operand.vmem [shape: f32[1,32], index: 14, kind: input, shape index: {}]   ;;  %s2302_s15 = inlined_call_operand.hbm [shape: f32[2,8,32], index: 15, kind: output, shape index: {}]  }
   0x1   :  { %2305 = sst [smem:[#allocation11_spill]] %s2287_s0 }
   0x2   :  { %2306 = sst [smem:[#allocation12_spill]] %s2288_s1 }
   0x3   :  { %2307 = sst [smem:[#allocation13_spill]] %s2289_s2 }
   0x4   :  { %2308 = sst [smem:[#allocation14_spill]] %s2290_s3 }
   0x5   :  { %20 = vsyncpa [#allocation6], 0 }
   0x6   :  { %22 = vsyncpa [#allocation6 + $0x1], 0  ;;  %s1997_s18 = smov 0   ;;  %s1999_s19 = smov 0  }
   0x7   :  { %s2001_s20 = smov 0   ;;  %s2003_s21 = smov 0  }
   0x8   :  { %s2005_s22 = smov 0   ;;  %s2007_s23 = smov 0  }
   0x9 LB: > { %2309 = sst [smem:[#allocation8_spill]] %s1901_s22  ;;  %s1530_s24 = sadd.s32 4294967295, %s1905_s23   ;;  %s1905_s23 = sphi %s2007_s23, %s28_s23   ;;  %s1901_s22 = sphi %s2005_s22, %s2320_s22   ;;  %s1897_s21 = sphi %s2003_s21, %s2319_s21   ;;  %s1893_s20 = sphi %s2001_s20, %s2323_s20   ;;  %s1889_s19 = sphi %s1999_s19, %s2322_s19   ;;  %s1885_s18 = sphi %s1997_s18, %s2321_s18  }
   0xa   : > { %s1531_s25 = sadd.s32 4294967294, %s1905_s23   ;;  %s40_s26 = sadd.s32 1, %s1901_s22 }
   0xb   : > { %s369_s27 = sadd.s32 1, %s1893_s20  ;;  %p42_p0 = scmp.ge.s32.totalorder %s40_s26, 2 }
   0xc   : > { %p379_p1 = scmp.ne.s32.totalorder %s1893_s20, %s1889_s19  ;;  %p380_p2 = scmp.eq.s32.totalorder %s1530_s24, 1 }
   0xd   : > { %p385_p3 = scmp.ne.s32.totalorder %s1889_s19, %s1885_s18  ;;  %s2325_s26 = smov (%p42_p0, %s40_s26), 0 }
   0xe   : > { %2310 = sst [smem:[#allocation9_spill]] %s2325_s26  ;;  %p2037_p4 = por %p380_p2, %p379_p1 }
   0xf   : > { %p386_p5 = scmp.eq.s32.totalorder %s1531_s25, 1  ;;  %s364_s29 = ssub.s32 %s1901_s22, %s2325_s26 }
  0x10   : > { %p1534_p6 = scmp.ge.s32.totalorder %s1905_s23, 1  ;;  %p367_p7 = scmp.eq.s32.totalorder %s364_s29, 0 }
  0x11   : > { %p2044_p8 = por %p386_p5, %p385_p3  ;;  %p453_p9 = scmp.lt.s32.totalorder %s1905_s23, 3 }
  0x12   : > { %s2050_s16 = scalar_select %p367_p7, %s1893_s20, %s369_s27  }
  0x13   : > { %p454_p10 = pnand %p1534_p6, %p453_p9 }
  0x14   : > { %2313 = sst [smem:[#allocation10_spill]] %s2050_s16  ;;  %s2314_s3 = sld [smem:[#allocation14_spill]] (!%p454_p10)  ;;  %v1907_v1 = vmov (!%p454_p10), 0.0   ;;  %vm1908_vm0 = vmmov (!%p454_p10), 0   ;;  %vm534_vm1 = vcmask (!%p454_p10), 261120   ;;  %vm579_vm2 = vcmask (!%p454_p10), 257024  }
  0x15   : > { %457 = sbr.rel (%p454_p10) target bundleno = 2558 (0x9fe), region = 80  ;;  %1625 = vmatprep.subr.bf16.mxu1 (!%p454_p10), %v1907_v1  ;;  %1653 = vmatprep.subr.bf16.mxu0 (!%p454_p10), %v1907_v1  ;;  %p500_p11 = scmp.lt.s32.totalorder (!%p454_p10), %s1897_s21, 1  ;;  %v1537_v7 = vld [vmem:[%s2291_s4] ss:$0 sm:$0xff] (!%p454_p10)  ;;  %vm663_vm3 = vcmask (!%p454_p10), 64512   ;;  %vm725_vm4 = vcmask (!%p454_p10), 1043456  }
  0x16   : > { %1629 = vmatprep.mubr.msk.bf16.mxu1 (!%p454_p10), %vm1908_vm0, %v1907_v1  ;;  %1655 = vmatprep.mubr.msk.bf16.mxu0 (!%p454_p10), %vm1908_vm0, %v1907_v1  ;;  %s2315_s1 = sld [smem:[#allocation12_spill]] (!%p454_p10)  ;;  %s2316_s0 = sld [smem:[#allocation11_spill]] (!%p454_p10)  ;;  %vm770_vm5 = vcmask (!%p454_p10), 60416   ;;  %vm896_vm6 = vcmask (!%p454_p10), 126016   ;;  %vm1015_vm7 = vcmask (!%p454_p10), 191616   ;;  %vm1134_vm8 = vcmask (!%p454_p10), 257216  }
  0x17   : > { %s2317_s2 = sld [smem:[#allocation13_spill]] (!%p454_p10)  ;;  %s1911_s24 = smov (!%p454_p10), 104  }
  0x18   : > { %s1912_s25 = smov (!%p454_p10), 96   ;;  %s497_s22 = sand.u32 (!%p454_p10), 1, %s1889_s19  }
  0x19   : > { %s1535_s26 = sshll.u32 (!%p454_p10), %s497_s22, 3 }
  0x1a   : > { %v1789_v0 = vld [vmem:[%s2314_s3] sm:$0xff] (!%p454_p10)   ;;  %v1790_v2 = vld [vmem:[%s2314_s3 + $0x8] sm:$0xff] (!%p454_p10)   ;;  %s1446_s3 = scalar_lea.sflag (!%p454_p10), [#allocation6], %s497_s22 }
  0x1b   : > { %1626 = vmatpush3.bf16.msra.mxu1 (!%p454_p10), %v1789_v0 }
  0x1c   : > { %1627 = vmatprep.subr.bf16.mxu1 %v1907_v1  ;;  %s501_s27 = scalar_select %p500_p11, %s1897_s21, 1  ;;  %v1791_v3 = vld [vmem:[%s2315_s1] sm:$0xff]   ;;  %v1792_v6 = vld [vmem:[%s2315_s1 + $0x8] sm:$0xff]  }
  0x1d   : > { %v1542_v14 = vld [vmem:[%s2317_s2] ss:$0 sm:$0xff] }
  0x1e   : > { %s1536_s17 = sshll.u32 %s501_s27, 3  ;;  %s1909_s27 = smov 112  }
  0x1f   : > { %1628 = vmatpush3.bf16.msra.mxu1 %v1790_v2  ;;  %s503_s29 = scalar_lea.vmem %s2316_s0, %s1536_s17  ;;  %s1910_s17 = smov 120  }
  0x20   : > { %1633 = vmatprep.subr.bf16.mxu1 %v1907_v1  ;;  %v2074_v4 = vld [vmem:[%s503_s29] sm:$0xff]  ;;  %s1913_s29 = smov 8  }
  0x21   : > { %v510_v5 = vpack.c.bf16 %v2074_v4, %v2074_v4 }
  0x23   : > { %1630 = vmatmul.mubr.msk.bf16.vlgmr.msra.gmra.mrb[0].mxu1 %vm534_vm1, %v510_v5 }
  0x24   : > { %1634 = vmatpush3.bf16.msra.mxu1 %v1791_v3  ;;  %1637 = vmatprep.mubr.msk.bf16.mxu1 %vm1908_vm0, %v1907_v1 }
  0x25   : > { %1635 = vmatprep.subr.bf16.mxu1 %v1907_v1 }
  0x28   : > { %1636 = vmatpush3.bf16.msra.mxu1 %v1792_v6 }
  0x29   : > { %1641 = vmatprep.subr.bf16.mxu1 %v1907_v1 }
  0x2b   : > { %1638 = vmatmul.mubr.msk.bf16.vlgmr.msra.gmra.mrb[4].mxu1 %vm534_vm1, %v510_v5 }
  0x2c   : > { %1643 = vmatprep.mubr.msk.bf16.mxu1 %vm1908_vm0, %v1907_v1 }
  0xf6   : > { %v572_v8 = vpop.f32.mrb[0].mxu1 }
  0xf7   : > { %v573_v9 = vadd.f32 %v1537_v7, %v572_v8  ;;  %v1631_v10 = vpop.f32.mrb[1].mxu1 }
  0xf8   : > { %v575_v11 = vpop.f32.mrb[2].mxu1 }
  0xf9   : > { %v2092_v12 = vpack.c.bf16 %v573_v9, %v573_v9  ;;  %v1632_v13 = vpop.f32.mrb[3].mxu1 }
  0xfb   : > { %580 = vst.msk [vmem:[#allocation2] sm:$0xf] %vm579_vm2, %v2092_v12 }
  0xfe   : > { %v653_v15 = vpop.f32.mrb[4].mxu1 }
  0xff   : > { %v654_v16 = vadd.f32 %v1542_v14, %v653_v15  ;;  %v1639_v17 = vpop.f32.mrb[5].mxu1 }
 0x100   : > { %v656_v18 = vpop.f32.mrb[6].mxu1 }
 0x101   : > { %v659_v19 = vmul.f32 0.35355338, %v654_v16  ;;  %v1640_v20 = vpop.f32.mrb[7].mxu1 }
 0x102   : > { %v661_v21 = vld [vmem:[#allocation2] sm:$0xf] }
 0x103   : > { %v668_v22 = vsel %vm663_vm3, %v661_v21, 0  ;;  %v1548_v23 = vcombine.low %v661_v21, %v661_v21  ;;  %v660_v24 = vpack.c.bf16 %v659_v19, %v659_v19 }
 0x104   : > { %1642 = vmatpush3.bf16.xpose.msra.mxu1 %v668_v22 }
 0x105   : > { %900 = vrot.lane.b32.xlu1 %v1548_v23, %s1909_s27  ;;  %778 = vrot.lane.b32.xlu0 %v1548_v23, %s1910_s17 }
 0x106   : > { %1647 = vmatprep.subr.bf16.mxu1 %v1907_v1 }
 0x109   : > { %898 = vrot.lane.b32.xlu1 %v660_v24, %s1909_s27  ;;  %773 = vrot.lane.b32.xlu0 %v660_v24, %s1910_s17 }
 0x10b   : > { %1644 = vmatmul.mubr.msk.bf16.vlgmr.msra.gmra.mrb[8].mxu1 %vm663_vm3, %v660_v24 }
 0x10c   : > { %1649 = vmatprep.mubr.msk.bf16.mxu1 %vm1908_vm0, %v1907_v1 }
 0x10d   : > { %1017 = vrot.lane.b32.xlu1 %v660_v24, %s1911_s24  ;;  %1019 = vrot.lane.b32.xlu0 %v1548_v23, %s1911_s24 }
 0x177   : > { %v779_v25 = vpop.permute.xlu0 %778  ;;  %v901_v27 = vpop.permute.xlu1 %900 }
 0x178   : > { %v784_v26 = vsel %vm663_vm3, %v779_v25, 0  ;;  %v906_v29 = vsel %vm663_vm3, %v901_v27, 0 }
 0x179   : > { %1654 = vmatpush3.bf16.xpose.msra.mxu0 %v784_v26 }
 0x17a   : > { %1665 = vmatprep.subr.bf16.mxu0 %v1907_v1 }
 0x17b   : > { %v774_v28 = vpop.permute.xlu0 %773  ;;  %v899_v31 = vpop.permute.xlu1 %898 }
 0x17f   : > { %v1020_v30 = vpop.permute.xlu0 %1019  ;;  %v1018_v33 = vpop.permute.xlu1 %1017 }
 0x180   : > { %1656 = vmatmul.mubr.msk.bf16.vlgmr.msra.gmra.mrb[0].mxu0 %vm663_vm3, %v774_v28  ;;  %v1025_v32 = vsel %vm663_vm3, %v1020_v30, 0 }
 0x181   : > { %1666 = vmatpush3.bf16.xpose.msra.mxu0 %v906_v29  ;;  %1667 = vmatprep.mubr.msk.bf16.mxu0 %vm1908_vm0, %v1907_v1 }
 0x182   : > { %1677 = vmatprep.subr.bf16.mxu0 %v1907_v1 }
 0x188   : > { %1668 = vmatmul.mubr.msk.bf16.vlgmr.msra.gmra.mrb[4].mxu0 %vm663_vm3, %v899_v31 }
 0x189   : > { %1678 = vmatpush3.bf16.xpose.msra.mxu0 %v1025_v32  ;;  %1679 = vmatprep.mubr.msk.bf16.mxu0 %vm1908_vm0, %v1907_v1 }
 0x18a   : > { %1689 = vmatprep.subr.bf16.mxu0 %v1907_v1 }
 0x190   : > { %1680 = vmatmul.mubr.msk.bf16.vlgmr.msra.gmra.mrb[8].mxu0 %vm663_vm3, %v1018_v33 }
 0x191   : > { %1693 = vmatprep.mubr.msk.bf16.mxu0 %vm1908_vm0, %v1907_v1 }
 0x1de   : > { %v704_v34 = vpop.f32.mrb[8].mxu1 }
 0x1df   : > { %v1645_v35 = vpop.f32.mrb[9].mxu1  ;;  %v710_v36 = vsel %vm663_vm3, %v704_v34, -inf }
 0x1e0   : > { %711 = vmax.xlane.f32.xlu0 %v710_v36  ;;  %v707_v37 = vpop.f32.mrb[10].mxu1 }
 0x1e1   : > { %v1646_v38 = vpop.f32.mrb[11].mxu1 }
 0x253   : > { %v820_v39 = vpop.f32.mrb[0].mxu0 }
 0x254   : > { %v1657_v40 = vpop.f32.mrb[1].mxu0  ;;  %v826_v41 = vsel %vm663_vm3, %v820_v39, -inf }
 0x255   : > { %827 = vmax.xlane.f32.xlu1 %v826_v41  ;;  %v823_v42 = vpop.f32.mrb[2].mxu0 }
 0x256   : > { %v1658_v43 = vpop.f32.mrb[3].mxu0 }
 0x25b   : > { %v942_v44 = vpop.f32.mrb[4].mxu0 }
 0x25c   : > { %v1669_v45 = vpop.f32.mrb[5].mxu0  ;;  %v948_v46 = vsel %vm663_vm3, %v942_v44, -inf }
 0x25d   : > { %v945_v47 = vpop.f32.mrb[6].mxu0  ;;  %949 = vmax.xlane.f32.xlu0 %v948_v46 }
 0x25e   : > { %v1670_v48 = vpop.f32.mrb[7].mxu0 }
 0x25f   : > { %v1795_v48 = vld [vmem:[%s2292_s5] sm:$0xff]  }
 0x260   : > { %1690 = vmatpush3.bf16.msra.mxu0 %v1795_v48 }
 0x261   : > { %1691 = vmatprep.subr.bf16.mxu0 %v1907_v1 }
 0x263   : > { %v1061_v49 = vpop.f32.mrb[8].mxu0 }
 0x264   : > { %v1681_v50 = vpop.f32.mrb[9].mxu0  ;;  %v1067_v51 = vsel %vm663_vm3, %v1061_v49, -inf }
 0x265   : > { %v1064_v52 = vpop.f32.mrb[10].mxu0  ;;  %1068 = vmax.xlane.f32.xlu0 %v1067_v51 }
 0x266   : > { %584 = vrot.lane.b32.xlu1 %v2092_v12, %s1912_s25  ;;  %v1682_v53 = vpop.f32.mrb[11].mxu0  ;;  %s499_s25 = scalar_lea.vmem [#allocation5], %s1535_s26 }
 0x26d   : > { %v712_v54 = vpop.xlane.xlu0 %711 }
 0x26e   : > { %v713_v55 = vsub.f32 %v704_v34, %v712_v54 }
 0x270   : > { %v714_v56 = vmul.f32 1.442695, %v713_v55 }
 0x272   : > { %1807 = vpow2.f32 %v714_v56 }
 0x27c   : > { %v1808_v57 = vpop.eup %1807 }
 0x27d   : > { %v716_v58 = vsel %vm663_vm3, %v1808_v57, 0.0 }
 0x27e   : > { %717 = vadd.xlane.f32.xlu0 %v716_v58 }
 0x2e2   : > { %v828_v59 = vpop.xlane.xlu1 %827 }
 0x2e3   : > { %v829_v60 = vsub.f32 %v820_v39, %v828_v59 }
 0x2e5   : > { %v830_v61 = vmul.f32 1.442695, %v829_v60 }
 0x2e6   : > { %v585_v62 = vpop.permute.xlu1 %584 }
 0x2e7   : > { %1809 = vpow2.f32 %v830_v61  ;;  %587 = vst.msk [vmem:[#allocation3] sm:$0xf] %vm579_vm2, %v585_v62 }
 0x2ea   : > { %v950_v63 = vpop.xlane.xlu0 %949 }
 0x2eb   : > { %v951_v0 = vsub.f32 %v942_v44, %v950_v63 }
 0x2ed   : > { %v952_v2 = vmul.f32 1.442695, %v951_v0  ;;  %v1559_v0 = vld [vmem:[%s2293_s6] ss:$0 sm:$0xff] }
 0x2ee   : > { %v662_v3 = vld [vmem:[#allocation3] sm:$0xf] }
 0x2ef   : > { %1811 = vpow2.f32 %v952_v2  ;;  %v727_v5 = vsel %vm725_vm4, %v662_v3, 0  ;;  %v1550_v6 = vcombine.low %v662_v3, %v662_v3 }
 0x2f0   : > { %1648 = vmatpush3.bf16.msra.mxu1 %v727_v5 }
 0x2f1   : > { %v1810_v7 = vpop.eup %1809  ;;  %841 = vrot.lane.b32.xlu1 %v1550_v6, %s1910_s17  ;;  %1659 = vmatprep.subr.bf16.mxu1 %v1907_v1  ;;  %s1915_s17 = smov 24  }
 0x2f2   : > { %v1069_v8 = vpop.xlane.xlu0 %1068  ;;  %v832_v9 = vsel %vm663_vm3, %v1810_v7, 0.0 }
 0x2f3   : > { %v1070_v10 = vsub.f32 %v1061_v49, %v1069_v8  ;;  %833 = vadd.xlane.f32.xlu0 %v832_v9  ;;  %v1796_v49 = vld [vmem:[%s2292_s5 + $0x8] sm:$0xff]  }
 0x2f4   : > { %1692 = vmatpush3.bf16.msra.mxu0 %v1796_v49 }
 0x2f5   : > { %v1071_v11 = vmul.f32 1.442695, %v1070_v10  ;;  %1079 = vrot.lane.b32.xlu1 %v1550_v6, %s1911_s24  ;;  %1705 = vmatprep.subr.bf16.mxu0 %v1907_v1  ;;  %s1581_s24 = sshll.u32 %s1897_s21, 7  ;;  %s1916_s21 = smov [#allocation5]  }
 0x2f6   : > { %s2239_s2 = scalar_lea.hbm %s2302_s15, %s1581_s24  ;;  %s1831_s26 = sshll.u32 %s1916_s21, 4  ;;  %s1832_s26 = int_to_ptr.vmem [resolvable:$false] %s1831_s26 }
 0x2f7   : > { %1813 = vpow2.f32 %v1071_v11 }
 0x2f9   : > { %v1812_v12 = vpop.eup %1811 }
 0x2fa   : > { %v954_v13 = vsel %vm663_vm3, %v1812_v12, 0.0 }
 0x2fb   : > { %955 = vadd.xlane.f32.xlu0 %v954_v13 }
 0x301   : > { %v1814_v14 = vpop.eup %1813 }
 0x302   : > { %v1073_v15 = vsel %vm663_vm3, %v1814_v14, 0.0 }
 0x303   : > { %1074 = vadd.xlane.f32.xlu0 %v1073_v15  ;;  %v1797_v15 = vld [vmem:[%s2296_s9] sm:$0xff]  }
 0x30b   : > { %v718_v16 = vpop.xlane.xlu0 %717 }
 0x30c   : > { %1815 = vrcp.f32 %v718_v16  ;;  %v1799_v16 = vld [vmem:[%s2298_s11] sm:$0xff]  }
 0x316   : > { %v1816_v17 = vpop.eup %1815 }
 0x317   : > { %v720_v18 = vmul.f32 %v1816_v17, %v1808_v57  ;;  %v1800_v17 = vld [vmem:[%s2298_s11 + $0x8] sm:$0xff]  }
 0x319   : > { %960 = vrot.lane.b32.xlu0 %v1550_v6, %s1909_s27  ;;  %v721_v19 = vpack.c.bf16 %v720_v18, %v720_v18  ;;  %s1914_s27 = smov 16   ;;  %v1801_v18 = vld [vmem:[%s2298_s11 + $0x10] sm:$0xff]  }
 0x31b   : > { %1650 = vmatmul.mubr.msk.bf16.vlgmr.msra.gmra.mrb[12].mxu1 %vm663_vm3, %v721_v19  ;;  %v1802_v19 = vld [vmem:[%s2298_s11 + $0x18] sm:$0xff]  }
 0x31c   : > { %1661 = vmatprep.mubr.msk.bf16.mxu1 %vm1908_vm0, %v1907_v1 }
 0x363   : > { %v842_v20 = vpop.permute.xlu1 %841 }
 0x364   : > { %v847_v21 = vsel %vm725_vm4, %v842_v20, 0  ;;  %v1803_v20 = vld [vmem:[%s2298_s11 + $0x20] sm:$0xff]  }
 0x365   : > { %1660 = vmatpush3.bf16.msra.mxu1 %v847_v21  ;;  %v1804_v21 = vld [vmem:[%s2298_s11 + $0x28] sm:$0xff]  }
 0x366   : > { %1671 = vmatprep.subr.bf16.mxu1 %v1907_v1 }
 0x367   : > { %v1080_v32 = vpop.permute.xlu1 %1079 }
 0x368   : > { %v1085_v34 = vsel %vm725_vm4, %v1080_v32, 0  ;;  %v1805_v32 = vld [vmem:[%s2298_s11 + $0x30] sm:$0xff]  }
 0x380   : > { %v834_v22 = vpop.xlane.xlu0 %833 }
 0x381   : > { %1817 = vrcp.f32 %v834_v22 }
 0x388   : > { %v956_v23 = vpop.xlane.xlu0 %955 }
 0x389   : > { %1819 = vrcp.f32 %v956_v23 }
 0x38b   : > { %v1818_v24 = vpop.eup %1817 }
 0x38c   : > { %v836_v25 = vmul.f32 %v1818_v24, %v1810_v7 }
 0x38e   : > { %v837_v26 = vpack.c.bf16 %v836_v25, %v836_v25 }
 0x390   : > { %1662 = vmatmul.mubr.msk.bf16.vlgmr.msra.gmra.mrb[16].mxu1 %vm663_vm3, %v837_v26  ;;  %v1075_v27 = vpop.xlane.xlu0 %1074  ;;  %v1563_v26 = vld [vmem:[%s2294_s7] ss:$0 sm:$0xff] }
 0x391   : > { %1821 = vrcp.f32 %v1075_v27  ;;  %1673 = vmatprep.mubr.msk.bf16.mxu1 %vm1908_vm0, %v1907_v1 }
 0x393   : > { %v1820_v28 = vpop.eup %1819 }
 0x394   : > { %v958_v29 = vmul.f32 %v1820_v28, %v1812_v12  ;;  %v961_v30 = vpop.permute.xlu0 %960  ;;  %v1564_v28 = vld [vmem:[%s2295_s8] ss:$0 sm:$0xff] }
 0x395   : > { %v966_v31 = vsel %vm725_vm4, %v961_v30, 0 }
 0x396   : > { %1672 = vmatpush3.bf16.msra.mxu1 %v966_v31  ;;  %v959_v33 = vpack.c.bf16 %v958_v29, %v958_v29 }
 0x397   : > { %1683 = vmatprep.subr.bf16.mxu1 %v1907_v1 }
 0x399   : > { %1674 = vmatmul.mubr.msk.bf16.vlgmr.msra.gmra.mrb[20].mxu1 %vm663_vm3, %v959_v33  ;;  %v1806_v33 = vld [vmem:[%s2298_s11 + $0x38] sm:$0xff]  }
 0x39a   : > { %1684 = vmatpush3.bf16.msra.mxu1 %v1085_v34  ;;  %1685 = vmatprep.mubr.msk.bf16.mxu1 %vm1908_vm0, %v1907_v1  ;;  %v1565_v34 = vld [vmem:[%s2297_s10] ss:$0 sm:$0xff] }
 0x39b   : > { %v1822_v35 = vpop.eup %1821  ;;  %1697 = vmatprep.subr.bf16.mxu1 %v1907_v1 }
 0x39c   : > { %v1077_v36 = vmul.f32 %v1822_v35, %v1814_v14 }
 0x39e   : > { %v1078_v37 = vpack.c.bf16 %v1077_v36, %v1077_v36 }
 0x3a1   : > { %1686 = vmatmul.mubr.msk.bf16.vlgmr.msra.gmra.mrb[24].mxu1 %vm663_vm3, %v1078_v37 }
 0x3a2   : > { %1701 = vmatprep.mubr.msk.bf16.mxu1 %vm1908_vm0, %v1907_v1  ;;  %1698 = vmatpush3.bf16.msra.mxu1 %v1797_v15 }
 0x3a3   : > { %1699 = vmatprep.subr.bf16.mxu1 %v1907_v1 }
 0x3ee   : > { %v763_v38 = vpop.f32.mrb[12].mxu1 }
 0x3ef   : > { %v769_v39 = vpack.c.bf16 %v763_v38, %v763_v38  ;;  %v1651_v40 = vpop.f32.mrb[13].mxu1 }
 0x3f0   : > { %v766_v41 = vpop.f32.mrb[14].mxu1 }
 0x3f1   : > { %771 = vst.msk [vmem:[#allocation4] sm:$0xf] %vm770_vm5, %v769_v39  ;;  %v1652_v42 = vpop.f32.mrb[15].mxu1 }
 0x463   : > { %v883_v43 = vpop.f32.mrb[16].mxu1 }
 0x464   : > { %v1585_v44 = vpack.c.bf16 %v883_v43, %v883_v43  ;;  %v1663_v45 = vpop.f32.mrb[17].mxu1 }
 0x465   : > { %v886_v46 = vpop.f32.mrb[18].mxu1 }
 0x466   : > { %893 = vrot.lane.b32.xlu1 %v1585_v44, %s1913_s29  ;;  %v1664_v47 = vpop.f32.mrb[19].mxu1  ;;  %s1460_s29 = sshll.u32 %s499_s25, 4  ;;  %s2241_s29 = int_to_ptr.vmem [resolvable:$true] %s1460_s29 }
 0x467   : > { %s1827_s16 = scalar_lea.vmem %s2241_s29, 128  ;;  %p1834_p1 = scmp.lt.s32.totalorder %s2241_s29, %s1832_s26 }
 0x468   : > { %p1828_p12 = scmp.ne.s32.totalorder %s2241_s29, %s1827_s16 }
 0x46a   : > { %p1829_p13 = pnand %p1828_p12, %p2037_p4 }
 0x46c   : > { %v1002_v50 = vpop.f32.mrb[20].mxu1  ;;  %p1830_p0 = pneg %p1829_p13 }
 0x46d   : > { %v1586_v51 = vpack.c.bf16 %v1002_v50, %v1002_v50  ;;  %v1675_v52 = vpop.f32.mrb[21].mxu1 }
 0x46e   : > { %v1005_v53 = vpop.f32.mrb[22].mxu1 }
 0x46f   : > { %1012 = vrot.lane.b32.xlu1 %v1586_v51, %s1914_s27  ;;  %v1676_v54 = vpop.f32.mrb[23].mxu1  ;;  %s1833_s27 = scalar_lea.vmem %s1832_s26, 256 }
 0x470   : > { %p1835_p2 = scmp.lt.s32.totalorder %s1833_s27, %s1827_s16 }
 0x472   : > { %p1836_p3 = por %p1835_p2, %p1834_p1 }
 0x474   : > { %v1121_v55 = vpop.f32.mrb[24].mxu1  ;;  %p1837_p5 = pnand %p1836_p3, %p1830_p0 }
 0x475   : > { %v1587_v56 = vpack.c.bf16 %v1121_v55, %v1121_v55  ;;  %v1687_v57 = vpop.f32.mrb[25].mxu1 }
 0x476   : > { %v1124_v58 = vpop.f32.mrb[26].mxu1 }
 0x477   : > { %1131 = vrot.lane.b32.xlu1 %v1587_v56, %s1915_s17  ;;  %v1688_v59 = vpop.f32.mrb[27].mxu1  ;;  %v1578_v58 = vld [vmem:[%s2300_s13] ss:$0 sm:$0xff] }
 0x4d8   : > { %v894_v60 = vpop.permute.xlu1 %893 }
 0x4d9   : > { %897 = vst.msk [vmem:[#allocation4] sm:$0xf] %vm896_vm6, %v894_v60  ;;  %v1579_v60 = vld [vmem:[%s2301_s14] ss:$0 sm:$0xff] }
 0x4e1   : > { %v1013_v61 = vpop.permute.xlu1 %1012 }
 0x4e2   : > { %1016 = vst.msk [vmem:[#allocation4] sm:$0xf] %vm1015_vm7, %v1013_v61 }
 0x4e9   : > { %v1132_v62 = vpop.permute.xlu1 %1131 }
 0x4ea   : > { %1135 = vst.msk [vmem:[#allocation4] sm:$0xf] %vm1134_vm8, %v1132_v62 }
 0x4f1   : > { %v1136_v63 = vld [vmem:[#allocation4] sm:$0xf] }
 0x4f2   : > { %1694 = vmatmul.mubr.msk.bf16.vlgmr.msra.gmra.mrb[12].mxu0 %vm534_vm1, %v1136_v63 }
 0x4f3   : > { %1721 = vmatprep.mubr.msk.bf16.mxu0 %vm1908_vm0, %v1907_v1  ;;  %1706 = vmatpush3.bf16.msra.mxu0 %v1799_v16 }
 0x4f4   : > { %1707 = vmatprep.subr.bf16.mxu0 %v1907_v1 }
 0x4f7   : > { %1708 = vmatpush3.bf16.msra.mxu0 %v1800_v17 }
 0x4f8   : > { %1709 = vmatprep.subr.bf16.mxu0 %v1907_v1 }
 0x4fb   : > { %1710 = vmatpush3.bf16.msra.mxu0 %v1801_v18 }
 0x4fc   : > { %1711 = vmatprep.subr.bf16.mxu0 %v1907_v1 }
 0x4ff   : > { %1712 = vmatpush3.bf16.msra.mxu0 %v1802_v19 }
 0x500   : > { %1713 = vmatprep.subr.bf16.mxu0 %v1907_v1 }
 0x503   : > { %1714 = vmatpush3.bf16.msra.mxu0 %v1803_v20 }
 0x504   : > { %1715 = vmatprep.subr.bf16.mxu0 %v1907_v1 }
 0x507   : > { %1716 = vmatpush3.bf16.msra.mxu0 %v1804_v21 }
 0x508   : > { %1717 = vmatprep.subr.bf16.mxu0 %v1907_v1 }
 0x50b   : > { %1718 = vmatpush3.bf16.msra.mxu0 %v1805_v32 }
 0x50c   : > { %1719 = vmatprep.subr.bf16.mxu0 %v1907_v1  ;;  %v1569_v1 = vld [vmem:[%s2299_s12] ss:$0 sm:$0xff] }
 0x50f   : > { %1720 = vmatpush3.bf16.msra.mxu0 %v1806_v33 }
 0x5c5   : > { %v1197_v2 = vpop.f32.mrb[12].mxu0 }
 0x5c6   : > { %v1198_v3 = vadd.f32 %v1559_v0, %v1197_v2  ;;  %v1695_v5 = vpop.f32.mrb[13].mxu0 }
 0x5c7   : > { %v1200_v6 = vpop.f32.mrb[14].mxu0 }
 0x5c8   : > { %v1696_v7 = vpop.f32.mrb[15].mxu0  ;;  %v1203_v8 = vadd.f32 %v1198_v3, %v2074_v4  ;;  %v1798_v4 = vld [vmem:[%s2296_s9 + $0x8] sm:$0xff]  }
 0x5c9   : > { %1700 = vmatpush3.bf16.msra.mxu1 %v1798_v4 }
 0x5ca   : > { %v1206_v9 = vsel %vm534_vm1, %v1203_v8, 0.0 }
 0x5cb   : > { %1207 = vadd.xlane.f32.xlu1 %v1206_v9 }
 0x658   : > { %v1208_v10 = vpop.xlane.xlu1 %1207 }
 0x659   : > { %v1210_v11 = vmul.f32 0.03125, %v1208_v10 }
 0x65b   : > { %v1211_v12 = vsub.f32 %v1203_v8, %v1210_v11 }
 0x65d   : > { %v1212_v13 = vmul.f32 %v1211_v12, %v1211_v12 }
 0x65f   : > { %v1213_v14 = vsel %vm534_vm1, %v1212_v13, 0.0 }
 0x660   : > { %1214 = vadd.xlane.f32.xlu0 %v1213_v14 }
 0x6ed   : > { %v1215_v22 = vpop.xlane.xlu0 %1214 }
 0x6ee   : > { %v1216_v23 = vmul.f32 0.03125, %v1215_v22 }
 0x6f0   : > { %v1217_v24 = vadd.f32 1e-05, %v1216_v23 }
 0x6f2   : > { %1823 = vrsqrt.f32 %v1217_v24 }
 0x6fc   : > { %v1824_v25 = vpop.eup %1823 }
 0x6fd   : > { %v1219_v27 = vmul.f32 %v1824_v25, %v1211_v12 }
 0x6ff   : > { %v1226_v29 = vmul.f32 %v1563_v26, %v1219_v27 }
 0x701   : > { %v1233_v30 = vadd.f32 %v1564_v28, %v1226_v29 }
 0x703   : > { %v1234_v31 = vpack.c.bf16 %v1233_v30, %v1233_v30 }
 0x705   : > { %1702 = vmatmul.mubr.msk.bf16.vlgmr.msra.gmra.mrb[28].mxu1 %vm534_vm1, %v1234_v31 }
 0x7d8   : > { %v1295_v35 = vpop.f32.mrb[28].mxu1 }
 0x7d9   : > { %v1296_v36 = vadd.f32 %v1565_v34, %v1295_v35  ;;  %v1703_v37 = vpop.f32.mrb[29].mxu1 }
 0x7da   : > { %v1298_v38 = vpop.f32.mrb[30].mxu1 }
 0x7db   : > { %v1301_v39 = vmax.f32 %v1296_v36, 0.0  ;;  %v1704_v40 = vpop.f32.mrb[31].mxu1 }
 0x7dd   : > { %v1302_v41 = vpack.c.bf16 %v1301_v39, %v1301_v39 }
 0x7df   : > { %1722 = vmatmul.mubr.bf16.vlgmr.msra.gmra.mrb[16].mxu0 %v1302_v41 }
 0x8b2   : > { %v1408_v42 = vpop.f32.mrb[16].mxu0 }
 0x8b3   : > { %v1409_v43 = vadd.f32 %v1569_v1, %v1408_v42  ;;  %v1723_v44 = vpop.f32.mrb[17].mxu0 }
 0x8b4   : > { %v1411_v45 = vpop.f32.mrb[18].mxu0 }
 0x8b5   : > { %v1724_v46 = vpop.f32.mrb[19].mxu0  ;;  %v1414_v47 = vadd.f32 %v1409_v43, %v1233_v30 }
 0x8b7   : > { %v1417_v48 = vsel %vm534_vm1, %v1414_v47, 0.0 }
 0x8b8   : > { %1418 = vadd.xlane.f32.xlu0 %v1417_v48 }
 0x945   : > { %v1419_v49 = vpop.xlane.xlu0 %1418 }
 0x946   : > { %v1420_v50 = vmul.f32 0.03125, %v1419_v49 }
 0x948   : > { %v1421_v51 = vsub.f32 %v1414_v47, %v1420_v50 }
 0x94a   : > { %v1422_v52 = vmul.f32 %v1421_v51, %v1421_v51 }
 0x94c   : > { %v1423_v53 = vsel %vm534_vm1, %v1422_v52, 0.0 }
 0x94d   : > { %1424 = vadd.xlane.f32.xlu1 %v1423_v53 }
 0x9da   : > { %v1425_v54 = vpop.xlane.xlu1 %1424 }
 0x9db   : > { %v1426_v55 = vmul.f32 0.03125, %v1425_v54 }
 0x9dd   : > { %v1427_v56 = vadd.f32 1e-05, %v1426_v55 }
 0x9df   : > { %1825 = vrsqrt.f32 %v1427_v56 }
 0x9e9   : > { %v1826_v57 = vpop.eup %1825 }
 0x9ea   : > { %v1429_v59 = vmul.f32 %v1826_v57, %v1421_v51 }
 0x9ec   : > { %v1436_v61 = vmul.f32 %v1578_v58, %v1429_v59 }
 0x9ee   : > { %v1443_v62 = vadd.f32 %v1579_v60, %v1436_v61 }
 0x9f0   : > { %1444 = vst.msk [vmem:[%s499_s25] sm:$0xff] %vm534_vm1, %v1443_v62 }
 0x9f1   : > { %1840 = shalt.err (!%p1837_p5)
}
 0x9f2   : > { %s1841_s0 = scalar_lea.hbm %s2239_s2, 128  ;;  %s1845_s17 = scalar_lea.hbm %s2302_s15, 256 }
 0x9f3   : > { %p1842_p6 = scmp.ne.s32.totalorder %s2239_s2, %s1841_s0  ;;  %p1846_p10 = scmp.lt.u32.totalorder %s2239_s2, %s2302_s15 }
 0x9f4   : > { %p1847_p11 = scmp.lt.u32.totalorder %s1845_s17, %s1841_s0  ;;  %p1849_p13 = scmp.lt.u32.totalorder %s1841_s0, %s2239_s2 }
 0x9f5   : > { %p1843_p7 = pnand %p1842_p6, %p2037_p4 }
 0x9f6   : > { %p1848_p12 = por %p1847_p11, %p1846_p10 }
 0x9f7   : > { %p1844_p9 = pneg %p1843_p7 }
 0x9f8   : > { %p1850_p0 = por %p1849_p13, %p1848_p12 }
 0x9fa   : > { %p1851_p1 = pnand %p1850_p0, %p1844_p9 }
 0x9fc   : > { %1854 = shalt.err (!%p1851_p1)
}
 0x9fd   : > { %1725 = dma.vmem_to_hbm [thread:$0]  (%p2037_p4), %s2241_s29, 128, %s2239_s2, %s1446_s3  }
 0x9fe PF: > { %p1731_p2 = scmp.ge.s32.totalorder %s1905_s23, 2  ;;  %s1472_s16 = sand.u32 1, %s1885_s18  }
 0x9ff   : > { %s1473_s21 = scalar_lea.sflag [#allocation6], %s1472_s16 }
 0xa00   : > { %p1728_p3 = pnand %p1731_p2, %p2044_p8 }
 0xa02   : > { %1880 = dma.done.wait (!%p1728_p3), %s1473_s21, 128  }
 0xa03   : > { %1882 = vsyncadd (!%p1728_p3), %s1473_s21, 4294967168  ;;  %s28_s23 = sadd.s32 1, %s1905_s23   ;;  %s2318_s28 = sld [smem:[#allocation10_spill]] }
 0xa04   : > { %p25_p5 = scmp.ge.s32.totalorder %s28_s23, 4   ;;  %s2319_s21 = sld [smem:[#allocation8_spill]] }
 0xa05   : > { %s2320_s22 = sld [smem:[#allocation9_spill]]  ;;  %s2321_s18 = smov %s1889_s19 }
 0xa06   : > { %s2322_s19 = smov %s1893_s20  ;;  %27 = sbr.rel (!%p25_p5) target bundleno = 9 (0x9), region = 120 }
 0xa09   : > { %s2323_s20 = smov %s2318_s28 }
 0xa0d   :  { %1478 = vsyncpa [#allocation6], 1 }
 0xa0e   :  { %1480 = vsyncpa [#allocation6 + $0x1], 1 }

</bundles_post_ra>
